<compile_context>
chip_gen: v7x
topology: tpu7x:2x2x1
jax: 0.10.0
libtpu: 0.0.40
codegen_flags: <defaults>
</compile_context>

<pallas_src>
import functools

import jax
import jax.numpy as jnp
from jax.experimental import pallas as pl
from jax.experimental.pallas import tpu as pltpu

DROPOUT_P = 0.5          # PyTorch module default; training=True semantics (always applied)
TILE_N_MAX = 512         # row tile; sized for the 64 MiB VMEM of v7x (safe on v5e/v6e too)


def _round_up(x, m):
    return (x + m - 1) // m * m


def _dropout_mask(shape, seed, pid, layer, p):
    """Bernoulli(1-p) keep mask, pre-scaled by 1/(1-p).

    Counter-based hash PRNG (lowbias32) over (seed, grid tile, layer, element index).
    Uses only plain 32-bit integer VPU ops, so it lowers on real TPUs and in
    interpret mode alike, and gives an independent mask per row tile and per layer.
    """
    rows = jax.lax.broadcasted_iota(jnp.int32, shape, 0)
    cols = jax.lax.broadcasted_iota(jnp.int32, shape, 1)
    idx = (rows * shape[1] + cols).astype(jnp.uint32)

    salt = (pid * 2 + layer).astype(jnp.uint32) * jnp.uint32(0x85EBCA6B)
    x = idx ^ (seed.astype(jnp.uint32) * jnp.uint32(0x9E3779B9)) ^ salt
    # lowbias32 finalizer
    x = x ^ (x >> 16)
    x = x * jnp.uint32(0x7FEB352D)
    x = x ^ (x >> 15)
    x = x * jnp.uint32(0x846CA68B)
    x = x ^ (x >> 16)

    # top 23 bits -> uniform in [0, 1)
    u = (x >> 9).astype(jnp.int32).astype(jnp.float32) * jnp.float32(1.0 / (1 << 23))
    keep = u >= jnp.float32(p)                       # keep prob = 1 - p
    return keep.astype(jnp.float32) * jnp.float32(1.0 / (1.0 - p))


def prenet_kernel(seed_ref, x_ref, w1_ref, b1_ref, w2_ref, b2_ref, o_ref, *, dropout_p):
    pid = pl.program_id(0)
    seed = seed_ref[0]

    # layer 1: Linear -> ReLU -> dropout   (bf16 MXU operands, f32 accumulate)
    h = jnp.dot(x_ref[...], w1_ref[...], preferred_element_type=jnp.float32)
    h = jnp.maximum(h + b1_ref[...], jnp.float32(0.0))
    h = h * _dropout_mask(h.shape, seed, pid, 0, dropout_p)

    # layer 2: Linear -> ReLU -> dropout
    y = jnp.dot(h.astype(jnp.bfloat16), w2_ref[...], preferred_element_type=jnp.float32)
    y = jnp.maximum(y + b2_ref[...], jnp.float32(0.0))
    y = y * _dropout_mask(y.shape, seed, pid, 1, dropout_p)

    o_ref[...] = y.astype(o_ref.dtype)


def prenet_forward(x, w1, b1, w2, b2, seed, *, dropout_p=DROPOUT_P):
    """x: (batch, seq, d_in) float32. Returns (batch, seq, d_out) float32."""
    B, T, Din = x.shape
    Dh = w1.shape[1]
    Do = w2.shape[1]
    N = B * T

    din_p = _round_up(Din, 128)                       # lane-align the contraction dim
    tile_n = min(TILE_N_MAX, _round_up(N, 8))         # rows per grid step (sublane aligned)
    n_p = _round_up(N, tile_n)
    num_tiles = n_p // tile_n

    # Flatten, zero-pad rows to a tile multiple and features to 128, cast to bf16.
    xf = x.reshape(N, Din).astype(jnp.float32)
    xf = jnp.pad(xf, ((0, n_p - N), (0, din_p - Din))).astype(jnp.bfloat16)
    w1p = jnp.pad(w1.astype(jnp.float32), ((0, din_p - Din), (0, 0))).astype(jnp.bfloat16)
    w2p = w2.astype(jnp.bfloat16)
    b1p = b1.reshape(1, Dh).astype(jnp.float32)
    b2p = b2.reshape(1, Do).astype(jnp.float32)

    grid_spec = pltpu.PrefetchScalarGridSpec(
        num_scalar_prefetch=1,                        # seed scalar in SMEM
        grid=(num_tiles,),
        in_specs=[
            pl.BlockSpec((tile_n, din_p), lambda i, seed_ref: (i, 0)),  # x tile (streams)
            pl.BlockSpec((din_p, Dh),     lambda i, seed_ref: (0, 0)),  # w1 (resident)
            pl.BlockSpec((1, Dh),         lambda i, seed_ref: (0, 0)),  # b1 (resident)
            pl.BlockSpec((Dh, Do),        lambda i, seed_ref: (0, 0)),  # w2 (resident)
            pl.BlockSpec((1, Do),         lambda i, seed_ref: (0, 0)),  # b2 (resident)
        ],
        out_specs=pl.BlockSpec((tile_n, Do), lambda i, seed_ref: (i, 0)),
    )

    cost = pl.CostEstimate(
        flops=2 * n_p * (din_p * Dh + Dh * Do),
        transcendentals=0,
        bytes_accessed=(n_p * din_p * 2 + din_p * Dh * 2 + Dh * Do * 2
                        + (Dh + Do) * 4 + n_p * Do * 4),
    )

    out = pl.pallas_call(
        functools.partial(prenet_kernel, dropout_p=dropout_p),
        out_shape=jax.ShapeDtypeStruct((n_p, Do), jnp.float32),
        grid_spec=grid_spec,
        compiler_params=pltpu.CompilerParams(
            dimension_semantics=("parallel",),        # shard row tiles across TCs (v7x)
            vmem_limit_bytes=32 * 1024 * 1024,        # well above tile math; fits all gens
        ),
        cost_estimate=cost,
    )(jnp.asarray([seed], jnp.int32), xf, w1p, b1p, w2p, b2p)

    return out[:N].reshape(B, T, Do)


def init_prenet_params(key, dims=(80, 256, 256)):
    """Deterministic init matching nn.Linear's U(-1/sqrt(fan_in), 1/sqrt(fan_in))."""
    params = []
    for i in range(1, len(dims)):
        fan_in, fan_out = dims[i - 1], dims[i]
        key, kw, kb = jax.random.split(key, 3)
        bound = 1.0 / jnp.sqrt(fan_in)
        w = jax.random.uniform(kw, (fan_in, fan_out), jnp.float32, -bound, bound)
        b = jax.random.uniform(kb, (fan_out,), jnp.float32, -bound, bound)
        params.append((w, b))
    return params


if __name__ == "__main__":
    key = jax.random.PRNGKey(0)
    kx, kp = jax.random.split(key)

    batch, seq, d_in = 2, 8, 80
    x = jax.random.normal(kx, (batch, seq, d_in), jnp.float32)

    (w1, b1), (w2, b2) = init_prenet_params(kp, dims=(80, 256, 256))

    out = prenet_forward(x, w1, b1, w2, b2, seed=1234)
    out = jax.block_until_ready(out)

    assert out.shape == (batch, seq, 256), out.shape
    assert out.dtype == jnp.float32
    # ReLU + dropout -> all outputs non-negative, some positive, a large fraction zeroed
    assert bool(jnp.all(out >= 0.0))
    assert bool(jnp.any(out > 0.0))
    zero_frac = float(jnp.mean(out == 0.0))
    assert 0.2 <= zero_frac <= 0.98, zero_frac

    print("KERNEL_OK")
</pallas_src>

<mosaic_0001>
module attributes {stable_mosaic.version = 11 : i64} {
  func.func @prenet_kernel(%arg0: i32, %arg1: memref<1xi32, #tpu.memory_space<smem>>, %arg2: memref<16x128xbf16, #tpu.memory_space<vmem>>, %arg3: memref<128x256xbf16, #tpu.memory_space<vmem>>, %arg4: memref<1x256xf32, #tpu.memory_space<vmem>>, %arg5: memref<256x256xbf16, #tpu.memory_space<vmem>>, %arg6: memref<1x256xf32, #tpu.memory_space<vmem>>, %arg7: memref<16x256xf32, #tpu.memory_space<vmem>>) attributes {dimension_semantics = [#tpu.dimension_semantics<parallel>], iteration_bounds = array<i64: 1>, scalar_prefetch = 1 : i64, scratch_operands = 0 : i64, tpu.core_type = #tpu.core_type<tc>, window_params = [{transform_indices = @transform_0, window_bounds = array<i64: 16, 128>}, {pipeline_mode = #tpu.pipeline_mode<synchronous>, transform_indices = @transform_1, window_bounds = array<i64: 128, 256>}, {pipeline_mode = #tpu.pipeline_mode<synchronous>, transform_indices = @transform_2, window_bounds = array<i64: 1, 256>}, {pipeline_mode = #tpu.pipeline_mode<synchronous>, transform_indices = @transform_3, window_bounds = array<i64: 256, 256>}, {pipeline_mode = #tpu.pipeline_mode<synchronous>, transform_indices = @transform_4, window_bounds = array<i64: 1, 256>}, {transform_indices = @transform_5, window_bounds = array<i64: 16, 256>}]} {
    %c0 = arith.constant 0 : index
    %0 = memref.load %arg1[%c0] : memref<1xi32, #tpu.memory_space<smem>>
    %c0_0 = arith.constant 0 : index
    %c0_1 = arith.constant 0 : index
    %1 = vector.load %arg2[%c0_0, %c0_1] : memref<16x128xbf16, #tpu.memory_space<vmem>>, vector<16x128xbf16>
    %c0_2 = arith.constant 0 : index
    %c0_3 = arith.constant 0 : index
    %2 = vector.load %arg3[%c0_2, %c0_3] : memref<128x256xbf16, #tpu.memory_space<vmem>>, vector<128x256xbf16>
    %cst = arith.constant dense<0.000000e+00> : vector<16x256xf32>
    %3 = tpu.matmul %1, %2, %cst {dimension_numbers = #tpu.dot_dimension_numbers<[1], [0], [0], [1], [0, 0, 1, 1], [], []>} : vector<16x128xbf16>, vector<128x256xbf16>, vector<16x256xf32> -> vector<16x256xf32>
    %c0_4 = arith.constant 0 : index
    %c0_5 = arith.constant 0 : index
    %4 = vector.load %arg4[%c0_4, %c0_5] : memref<1x256xf32, #tpu.memory_space<vmem>>, vector<1x256xf32>
    %5 = vector.broadcast %4 : vector<1x256xf32> to vector<16x256xf32>
    %6 = arith.addf %3, %5 : vector<16x256xf32>
    %cst_6 = arith.constant 0.000000e+00 : f32
    %7 = vector.broadcast %cst_6 : f32 to vector<16x256xf32>
    %8 = arith.maximumf %6, %7 : vector<16x256xf32>
    %9 = tpu.iota {dimensions = array<i32: 0>} : vector<16x256xi32>
    %10 = tpu.iota {dimensions = array<i32: 1>} : vector<16x256xi32>
    %c256_i32 = arith.constant 256 : i32
    %11 = vector.broadcast %c256_i32 : i32 to vector<16x256xi32>
    %12 = arith.muli %9, %11 : vector<16x256xi32>
    %13 = arith.addi %12, %10 : vector<16x256xi32>
    %c2_i32 = arith.constant 2 : i32
    %14 = arith.muli %arg0, %c2_i32 : i32
    %c0_i32 = arith.constant 0 : i32
    %15 = arith.addi %14, %c0_i32 : i32
    %c-2048144789_i32 = arith.constant -2048144789 : i32
    %16 = arith.muli %15, %c-2048144789_i32 : i32
    %c-1640531527_i32 = arith.constant -1640531527 : i32
    %17 = arith.muli %0, %c-1640531527_i32 : i32
    %18 = vector.broadcast %17 : i32 to vector<16x256xi32>
    %19 = arith.xori %13, %18 : vector<16x256xi32>
    %20 = vector.broadcast %16 : i32 to vector<16x256xi32>
    %21 = arith.xori %19, %20 : vector<16x256xi32>
    %c16_i32 = arith.constant 16 : i32
    %22 = vector.broadcast %c16_i32 : i32 to vector<16x256xi32>
    %23 = arith.shrui %21, %22 : vector<16x256xi32>
    %24 = arith.xori %21, %23 : vector<16x256xi32>
    %c2146121005_i32 = arith.constant 2146121005 : i32
    %25 = vector.broadcast %c2146121005_i32 : i32 to vector<16x256xi32>
    %26 = arith.muli %24, %25 : vector<16x256xi32>
    %c15_i32 = arith.constant 15 : i32
    %27 = vector.broadcast %c15_i32 : i32 to vector<16x256xi32>
    %28 = arith.shrui %26, %27 : vector<16x256xi32>
    %29 = arith.xori %26, %28 : vector<16x256xi32>
    %c-2073254261_i32 = arith.constant -2073254261 : i32
    %30 = vector.broadcast %c-2073254261_i32 : i32 to vector<16x256xi32>
    %31 = arith.muli %29, %30 : vector<16x256xi32>
    %c16_i32_7 = arith.constant 16 : i32
    %32 = vector.broadcast %c16_i32_7 : i32 to vector<16x256xi32>
    %33 = arith.shrui %31, %32 : vector<16x256xi32>
    %34 = arith.xori %31, %33 : vector<16x256xi32>
    %c9_i32 = arith.constant 9 : i32
    %35 = vector.broadcast %c9_i32 : i32 to vector<16x256xi32>
    %36 = arith.shrui %34, %35 : vector<16x256xi32>
    %37 = arith.sitofp %36 : vector<16x256xi32> to vector<16x256xf32>
    %cst_8 = arith.constant 1.1920929E-7 : f32
    %38 = vector.broadcast %cst_8 : f32 to vector<16x256xf32>
    %39 = arith.mulf %37, %38 : vector<16x256xf32>
    %cst_9 = arith.constant 5.000000e-01 : f32
    %40 = vector.broadcast %cst_9 : f32 to vector<16x256xf32>
    %41 = arith.cmpf oge, %39, %40 : vector<16x256xf32>
    %42 = arith.extui %41 : vector<16x256xi1> to vector<16x256xi32>
    %43 = arith.sitofp %42 : vector<16x256xi32> to vector<16x256xf32>
    %cst_10 = arith.constant 2.000000e+00 : f32
    %44 = vector.broadcast %cst_10 : f32 to vector<16x256xf32>
    %45 = arith.mulf %43, %44 : vector<16x256xf32>
    %46 = arith.mulf %8, %45 : vector<16x256xf32>
    %47 = arith.truncf %46 : vector<16x256xf32> to vector<16x256xbf16>
    %c0_11 = arith.constant 0 : index
    %c0_12 = arith.constant 0 : index
    %48 = vector.load %arg5[%c0_11, %c0_12] : memref<256x256xbf16, #tpu.memory_space<vmem>>, vector<256x256xbf16>
    %cst_13 = arith.constant dense<0.000000e+00> : vector<16x256xf32>
    %49 = tpu.matmul %47, %48, %cst_13 {dimension_numbers = #tpu.dot_dimension_numbers<[1], [0], [0], [1], [0, 0, 1, 1], [], []>} : vector<16x256xbf16>, vector<256x256xbf16>, vector<16x256xf32> -> vector<16x256xf32>
    %c0_14 = arith.constant 0 : index
    %c0_15 = arith.constant 0 : index
    %50 = vector.load %arg6[%c0_14, %c0_15] : memref<1x256xf32, #tpu.memory_space<vmem>>, vector<1x256xf32>
    %51 = vector.broadcast %50 : vector<1x256xf32> to vector<16x256xf32>
    %52 = arith.addf %49, %51 : vector<16x256xf32>
    %cst_16 = arith.constant 0.000000e+00 : f32
    %53 = vector.broadcast %cst_16 : f32 to vector<16x256xf32>
    %54 = arith.maximumf %52, %53 : vector<16x256xf32>
    %55 = tpu.iota {dimensions = array<i32: 0>} : vector<16x256xi32>
    %56 = tpu.iota {dimensions = array<i32: 1>} : vector<16x256xi32>
    %c256_i32_17 = arith.constant 256 : i32
    %57 = vector.broadcast %c256_i32_17 : i32 to vector<16x256xi32>
    %58 = arith.muli %55, %57 : vector<16x256xi32>
    %59 = arith.addi %58, %56 : vector<16x256xi32>
    %c2_i32_18 = arith.constant 2 : i32
    %60 = arith.muli %arg0, %c2_i32_18 : i32
    %c1_i32 = arith.constant 1 : i32
    %61 = arith.addi %60, %c1_i32 : i32
    %c-2048144789_i32_19 = arith.constant -2048144789 : i32
    %62 = arith.muli %61, %c-2048144789_i32_19 : i32
    %c-1640531527_i32_20 = arith.constant -1640531527 : i32
    %63 = arith.muli %0, %c-1640531527_i32_20 : i32
    %64 = vector.broadcast %63 : i32 to vector<16x256xi32>
    %65 = arith.xori %59, %64 : vector<16x256xi32>
    %66 = vector.broadcast %62 : i32 to vector<16x256xi32>
    %67 = arith.xori %65, %66 : vector<16x256xi32>
    %c16_i32_21 = arith.constant 16 : i32
    %68 = vector.broadcast %c16_i32_21 : i32 to vector<16x256xi32>
    %69 = arith.shrui %67, %68 : vector<16x256xi32>
    %70 = arith.xori %67, %69 : vector<16x256xi32>
    %c2146121005_i32_22 = arith.constant 2146121005 : i32
    %71 = vector.broadcast %c2146121005_i32_22 : i32 to vector<16x256xi32>
    %72 = arith.muli %70, %71 : vector<16x256xi32>
    %c15_i32_23 = arith.constant 15 : i32
    %73 = vector.broadcast %c15_i32_23 : i32 to vector<16x256xi32>
    %74 = arith.shrui %72, %73 : vector<16x256xi32>
    %75 = arith.xori %72, %74 : vector<16x256xi32>
    %c-2073254261_i32_24 = arith.constant -2073254261 : i32
    %76 = vector.broadcast %c-2073254261_i32_24 : i32 to vector<16x256xi32>
    %77 = arith.muli %75, %76 : vector<16x256xi32>
    %c16_i32_25 = arith.constant 16 : i32
    %78 = vector.broadcast %c16_i32_25 : i32 to vector<16x256xi32>
    %79 = arith.shrui %77, %78 : vector<16x256xi32>
    %80 = arith.xori %77, %79 : vector<16x256xi32>
    %c9_i32_26 = arith.constant 9 : i32
    %81 = vector.broadcast %c9_i32_26 : i32 to vector<16x256xi32>
    %82 = arith.shrui %80, %81 : vector<16x256xi32>
    %83 = arith.sitofp %82 : vector<16x256xi32> to vector<16x256xf32>
    %cst_27 = arith.constant 1.1920929E-7 : f32
    %84 = vector.broadcast %cst_27 : f32 to vector<16x256xf32>
    %85 = arith.mulf %83, %84 : vector<16x256xf32>
    %cst_28 = arith.constant 5.000000e-01 : f32
    %86 = vector.broadcast %cst_28 : f32 to vector<16x256xf32>
    %87 = arith.cmpf oge, %85, %86 : vector<16x256xf32>
    %88 = arith.extui %87 : vector<16x256xi1> to vector<16x256xi32>
    %89 = arith.sitofp %88 : vector<16x256xi32> to vector<16x256xf32>
    %cst_29 = arith.constant 2.000000e+00 : f32
    %90 = vector.broadcast %cst_29 : f32 to vector<16x256xf32>
    %91 = arith.mulf %89, %90 : vector<16x256xf32>
    %92 = arith.mulf %54, %91 : vector<16x256xf32>
    %c0_30 = arith.constant 0 : index
    %c0_31 = arith.constant 0 : index
    %93 = vector.load %arg7[%c0_30, %c0_31] : memref<16x256xf32, #tpu.memory_space<vmem>>, vector<16x256xf32>
    tpu.vector_store %arg7[%c0_30, %c0_31], %92 {strides = array<i32>} : memref<16x256xf32, #tpu.memory_space<vmem>>, vector<16x256xf32>,
    return
  }
  func.func @transform_0(%arg0: i32, %arg1: memref<1xi32, #tpu.memory_space<smem>>) -> (i32, i32) {
    %c0_i32 = arith.constant 0 : i32
    %c0_i32_0 = arith.constant 0 : i32
    return %arg0, %c0_i32 : i32, i32
  }
  func.func @transform_1(%arg0: i32, %arg1: memref<1xi32, #tpu.memory_space<smem>>) -> (i32, i32) {
    %c0_i32 = arith.constant 0 : i32
    %c0_i32_0 = arith.constant 0 : i32
    %c0_i32_1 = arith.constant 0 : i32
    return %c0_i32, %c0_i32_0 : i32, i32
  }
  func.func @transform_2(%arg0: i32, %arg1: memref<1xi32, #tpu.memory_space<smem>>) -> (i32, i32) {
    %c0_i32 = arith.constant 0 : i32
    %c0_i32_0 = arith.constant 0 : i32
    %c0_i32_1 = arith.constant 0 : i32
    return %c0_i32, %c0_i32_0 : i32, i32
  }
  func.func @transform_3(%arg0: i32, %arg1: memref<1xi32, #tpu.memory_space<smem>>) -> (i32, i32) {
    %c0_i32 = arith.constant 0 : i32
    %c0_i32_0 = arith.constant 0 : i32
    %c0_i32_1 = arith.constant 0 : i32
    return %c0_i32, %c0_i32_0 : i32, i32
  }
  func.func @transform_4(%arg0: i32, %arg1: memref<1xi32, #tpu.memory_space<smem>>) -> (i32, i32) {
    %c0_i32 = arith.constant 0 : i32
    %c0_i32_0 = arith.constant 0 : i32
    %c0_i32_1 = arith.constant 0 : i32
    return %c0_i32, %c0_i32_0 : i32, i32
  }
  func.func @transform_5(%arg0: i32, %arg1: memref<1xi32, #tpu.memory_space<smem>>) -> (i32, i32) {
    %c0_i32 = arith.constant 0 : i32
    %c0_i32_0 = arith.constant 0 : i32
    return %arg0, %c0_i32 : i32, i32
  }
}

</mosaic_0001>

<bundles_post_ra>
// kernel: tpu_custom_call.1
= control target key start
LH: loop header
LB: loop body
LE: loop exit
PB: predicated region body
PF: predicated region fallthrough
CT: control target
= control target key end

     0   :  { %12 = vsyncpa [#allocation5], 0  ;;  %s1052_s0 = inlined_call_operand.<no memory space> [shape: s32[1], index: 0, kind: input, shape index: {}]   ;;  %s1053_s1 = inlined_call_operand.hbm [shape: bf16[16,128], index: 1, kind: input, shape index: {}]   ;;  %s1054_s2 = inlined_call_operand.hbm [shape: bf16[128,256], index: 2, kind: input, shape index: {}]   ;;  %s1055_s3 = inlined_call_operand.vmem [shape: f32[1,256], index: 3, kind: input, shape index: {}]   ;;  %s1056_s4 = inlined_call_operand.hbm [shape: bf16[256,256], index: 4, kind: input, shape index: {}]   ;;  %s1057_s5 = inlined_call_operand.vmem [shape: f32[1,256], index: 5, kind: input, shape index: {}]   ;;  %s1058_s6 = inlined_call_operand.hbm [shape: f32[16,256], index: 6, kind: output, shape index: {}]  }
   0x1   :  { %13 = vsyncpa [#allocation8], 0 }
   0x2   :  { %14 = vsyncpa [#allocation6], 0  ;;  %s900_s21 = smov [#allocation7]   ;;  %s806_s25 = scalar_lea.hbm %s1054_s2, 2048 }
   0x3   :  { %s32_s22 = sshll.u32 %s900_s21, 4  ;;  %p807_p0 = scmp.ne.s32.totalorder %s1054_s2, %s806_s25  ;;  %s33_s22 = int_to_ptr.vmem [resolvable:$true] %s32_s22 }
   0x4   :  { %p810_p1 = scmp.lt.u32.totalorder %s806_s25, %s1054_s2 }
   0x6   :  { %p812_p2 = pnand %p810_p1, %p807_p0 }
   0x8   :  { %815 = shalt.err (!%p812_p2)
}
   0x9   :  { %s816_s30 = scalar_lea.vmem %s33_s22, 2048  ;;  %p821_p4 = scmp.lt.s32.totalorder %s33_s22, %s33_s22 }
   0xa   :  { %p817_p3 = scmp.ne.s32.totalorder %s33_s22, %s816_s30  ;;  %p822_p5 = scmp.lt.s32.totalorder %s816_s30, %s816_s30 }
   0xc   :  { %p823_p6 = por %p822_p5, %p821_p4 }
   0xe   :  { %p824_p7 = pnand %p823_p6, %p817_p3 }
  0x10   :  { %827 = shalt.err (!%p824_p7)
}
  0x11   :  { %s901_s7 = smov 128   ;;  %s902_s8 = smov 8  }
  0x12   :  { %38 = dma.hbm_to_vmem [thread:$0]  %s1054_s2, 2048, %s33_s22, [#allocation8], %s901_s7, %s901_s7, %s902_s8  }
  0x13   :  { %s903_s11 = smov [#allocation4]   ;;  %s828_s15 = scalar_lea.hbm %s1053_s1, 128 }
  0x14   :  { %s20_s12 = sshll.u32 %s903_s11, 4  ;;  %p829_p8 = scmp.ne.s32.totalorder %s1053_s1, %s828_s15  ;;  %s21_s12 = int_to_ptr.vmem [resolvable:$true] %s20_s12 }
  0x15   :  { %p832_p9 = scmp.lt.u32.totalorder %s828_s15, %s1053_s1 }
  0x17   :  { %p834_p10 = pnand %p832_p9, %p829_p8 }
  0x19   :  { %837 = shalt.err (!%p834_p10)
}
  0x1a   :  { %s838_s20 = scalar_lea.vmem %s21_s12, 128  ;;  %p843_p12 = scmp.lt.s32.totalorder %s21_s12, %s21_s12 }
  0x1b   :  { %p839_p11 = scmp.ne.s32.totalorder %s21_s12, %s838_s20  ;;  %p844_p13 = scmp.lt.s32.totalorder %s838_s20, %s838_s20 }
  0x1d   :  { %p845_p0 = por %p844_p13, %p843_p12 }
  0x1f   :  { %p846_p1 = pnand %p845_p0, %p839_p11 }
  0x21   :  { %849 = shalt.err (!%p846_p1)
}
  0x22   :  { %s904_s2 = smov 64   ;;  %s905_s21 = smov 4  }
  0x23   :  { %26 = dma.hbm_to_vmem [thread:$0]  %s1053_s1, 128, %s21_s12, [#allocation5], %s904_s2, %s904_s2, %s905_s21  }
  0x24   :  { %s906_s24 = smov [#allocation9]   ;;  %s850_s28 = scalar_lea.hbm %s1056_s4, 4096 }
  0x25   :  { %s46_s25 = sshll.u32 %s906_s24, 4  ;;  %p851_p2 = scmp.ne.s32.totalorder %s1056_s4, %s850_s28  ;;  %s47_s25 = int_to_ptr.vmem [resolvable:$true] %s46_s25 }
  0x26   :  { %p854_p3 = scmp.lt.u32.totalorder %s850_s28, %s1056_s4 }
  0x28   :  { %p856_p4 = pnand %p854_p3, %p851_p2 }
  0x2a   :  { %859 = shalt.err (!%p856_p4)
}
  0x2b   :  { %s860_s11 = scalar_lea.vmem %s47_s25, 4096  ;;  %p865_p6 = scmp.lt.s32.totalorder %s47_s25, %s47_s25 }
  0x2c   :  { %p861_p5 = scmp.ne.s32.totalorder %s47_s25, %s860_s11  ;;  %p866_p7 = scmp.lt.s32.totalorder %s860_s11, %s860_s11 }
  0x2e   :  { %p867_p8 = por %p866_p7, %p865_p6 }
  0x30   :  { %p868_p9 = pnand %p867_p8, %p861_p5 }
  0x32   :  { %871 = shalt.err (!%p868_p9)
}
  0x33   :  { %52 = dma.hbm_to_vmem [thread:$0]  %s1056_s4, 4096, %s47_s25, [#allocation8], %s901_s7, %s901_s7, %s902_s8  }
  0x34   :  { %894 = dma.done.wait [#allocation5], 128  }
  0x35   :  { %895 = vsyncadd [#allocation5], 4294967168 }
  0x36   :  { %896 = dma.done.wait [#allocation8], 6144  }
  0x37   :  { %897 = vsyncadd [#allocation8], 4294961152  ;;  %v907_v0 = vmov 0   ;;  %v733_v1 = vld [vmem:[#allocation7 + $0x4] ss:$8 sps:$4 sm:$0xff]   ;;  %v757_v28 = vld [vmem:[#allocation4] sm:$0xff]   ;;  %v86_v50 = vlaneseq }
  0x38   :  { %214 = vmatprep.mubr.bf16.mxu0 %v907_v0  ;;  %v735_v2 = vld [vmem:[#allocation7] ss:$8 sps:$4 sm:$0xff]   ;;  %182 = vmatprep.subr.bf16.mxu0 %v733_v1  ;;  %v736_v3 = vld [vmem:[#allocation7 + $0x14] ss:$8 sps:$4 sm:$0xff]   ;;  %v738_v4 = vld [vmem:[#allocation7 + $0x10] ss:$8 sps:$4 sm:$0xff]  }
  0x39   :  { %183 = vmatpush1.bf16.msra.mxu0 %v735_v2  ;;  %v739_v5 = vld [vmem:[#allocation7 + $0x24] ss:$8 sps:$4 sm:$0xff]   ;;  %v741_v6 = vld [vmem:[#allocation7 + $0x20] ss:$8 sps:$4 sm:$0xff]   ;;  %v742_v7 = vld [vmem:[#allocation7 + $0x34] ss:$8 sps:$4 sm:$0xff]  }
  0x3a   :  { %184 = vmatprep.subr.bf16.mxu0 %v736_v3  ;;  %v744_v8 = vld [vmem:[#allocation7 + $0x30] ss:$8 sps:$4 sm:$0xff]   ;;  %v745_v9 = vld [vmem:[#allocation7 + $0x44] ss:$8 sps:$4 sm:$0xff]   ;;  %v760_v11 = vld [vmem:[#allocation9] ss:$8 sps:$4 sm:$0xff]  }
  0x3b   :  { %v758_v10 = vld [vmem:[#allocation9 + $0x4] ss:$8 sps:$4 sm:$0xff]   ;;  %v761_v12 = vld [vmem:[#allocation9 + $0x14] ss:$8 sps:$4 sm:$0xff]   ;;  %v747_v13 = vld [vmem:[#allocation7 + $0x40] ss:$8 sps:$4 sm:$0xff]  }
  0x3c   :  { %523 = vmatprep.subr.bf16.mxu1 %v758_v10  ;;  %v763_v14 = vld [vmem:[#allocation9 + $0x10] ss:$8 sps:$4 sm:$0xff]   ;;  %v748_v15 = vld [vmem:[#allocation7 + $0x54] ss:$8 sps:$4 sm:$0xff]   ;;  %v764_v16 = vld [vmem:[#allocation9 + $0x24] ss:$8 sps:$4 sm:$0xff]  }
  0x3d   :  { %185 = vmatpush1.bf16.msra.mxu0 %v738_v4  ;;  %524 = vmatpush1.bf16.msra.mxu1 %v760_v11  ;;  %v750_v17 = vld [vmem:[#allocation7 + $0x50] ss:$8 sps:$4 sm:$0xff]   ;;  %v766_v18 = vld [vmem:[#allocation9 + $0x20] ss:$8 sps:$4 sm:$0xff]   ;;  %v751_v19 = vld [vmem:[#allocation7 + $0x64] ss:$8 sps:$4 sm:$0xff]  }
  0x3e   :  { %186 = vmatprep.subr.bf16.mxu0 %v739_v5  ;;  %525 = vmatprep.subr.bf16.mxu1 %v761_v12  ;;  %v767_v20 = vld [vmem:[#allocation9 + $0x34] ss:$8 sps:$4 sm:$0xff]   ;;  %v753_v21 = vld [vmem:[#allocation7 + $0x60] ss:$8 sps:$4 sm:$0xff]   ;;  %v769_v22 = vld [vmem:[#allocation9 + $0x30] ss:$8 sps:$4 sm:$0xff]  }
  0x3f   :  { %v754_v23 = vld [vmem:[#allocation7 + $0x74] ss:$8 sps:$4 sm:$0xff]   ;;  %v770_v24 = vld [vmem:[#allocation9 + $0x44] ss:$8 sps:$4 sm:$0xff]   ;;  %v756_v25 = vld [vmem:[#allocation7 + $0x70] ss:$8 sps:$4 sm:$0xff]  }
  0x40   :  { %v772_v26 = vld [vmem:[#allocation9 + $0x40] ss:$8 sps:$4 sm:$0xff]   ;;  %v773_v27 = vld [vmem:[#allocation9 + $0x54] ss:$8 sps:$4 sm:$0xff]   ;;  %v775_v29 = vld [vmem:[#allocation9 + $0x50] ss:$8 sps:$4 sm:$0xff]  }
  0x41   :  { %187 = vmatpush1.bf16.msra.mxu0 %v741_v6  ;;  %526 = vmatpush1.bf16.msra.mxu1 %v763_v14  ;;  %v776_v30 = vld [vmem:[#allocation9 + $0x64] ss:$8 sps:$4 sm:$0xff]   ;;  %v778_v31 = vld [vmem:[#allocation9 + $0x60] ss:$8 sps:$4 sm:$0xff]   ;;  %v779_v32 = vld [vmem:[#allocation9 + $0x74] ss:$8 sps:$4 sm:$0xff]  }
  0x42   :  { %188 = vmatprep.subr.bf16.mxu0 %v742_v7  ;;  %527 = vmatprep.subr.bf16.mxu1 %v764_v16  ;;  %v781_v33 = vld [vmem:[#allocation9 + $0x70] ss:$8 sps:$4 sm:$0xff]   ;;  %v782_v34 = vld [vmem:[#allocation9 + $0x84] ss:$8 sps:$4 sm:$0xff]   ;;  %v784_v35 = vld [vmem:[#allocation9 + $0x80] ss:$8 sps:$4 sm:$0xff]  }
  0x43   :  { %v785_v36 = vld [vmem:[#allocation9 + $0x94] ss:$8 sps:$4 sm:$0xff]   ;;  %v787_v37 = vld [vmem:[#allocation9 + $0x90] ss:$8 sps:$4 sm:$0xff]   ;;  %v788_v38 = vld [vmem:[#allocation9 + $0xa4] ss:$8 sps:$4 sm:$0xff]  }
  0x44   :  { %v790_v39 = vld [vmem:[#allocation9 + $0xa0] ss:$8 sps:$4 sm:$0xff]   ;;  %v791_v40 = vld [vmem:[#allocation9 + $0xb4] ss:$8 sps:$4 sm:$0xff]   ;;  %v793_v41 = vld [vmem:[#allocation9 + $0xb0] ss:$8 sps:$4 sm:$0xff]  }
  0x45   :  { %189 = vmatpush1.bf16.msra.mxu0 %v744_v8  ;;  %528 = vmatpush1.bf16.msra.mxu1 %v766_v18  ;;  %v794_v42 = vld [vmem:[#allocation9 + $0xc4] ss:$8 sps:$4 sm:$0xff]   ;;  %v796_v43 = vld [vmem:[#allocation9 + $0xc0] ss:$8 sps:$4 sm:$0xff]   ;;  %v797_v44 = vld [vmem:[#allocation9 + $0xd4] ss:$8 sps:$4 sm:$0xff]  }
  0x46   :  { %190 = vmatprep.subr.bf16.mxu0 %v745_v9  ;;  %529 = vmatprep.subr.bf16.mxu1 %v767_v20  ;;  %v799_v45 = vld [vmem:[#allocation9 + $0xd0] ss:$8 sps:$4 sm:$0xff]   ;;  %v800_v46 = vld [vmem:[#allocation9 + $0xe4] ss:$8 sps:$4 sm:$0xff]   ;;  %v802_v47 = vld [vmem:[#allocation9 + $0xe0] ss:$8 sps:$4 sm:$0xff]  }
  0x47   :  { %v803_v48 = vld [vmem:[#allocation9 + $0xf4] ss:$8 sps:$4 sm:$0xff]   ;;  %v805_v49 = vld [vmem:[#allocation9 + $0xf0] ss:$8 sps:$4 sm:$0xff]   ;;  %v989_v51 = vshrl.u32 %v86_v50, 7  ;;  %v233_v53 = vand.u32 127, %v86_v50 }
  0x48   :  { %s242_s8 = smul.u32 2654435769, %s1052_s0 }
  0x49   :  { %191 = vmatpush1.bf16.msra.mxu0 %v747_v13  ;;  %530 = vmatpush1.bf16.msra.mxu1 %v769_v22  ;;  %v231_v52 = vadd.s32 8, %v989_v51  ;;  %v235_v54 = vmul.u32 256, %v989_v51  ;;  %v234_v56 = vadd.s32 128, %v233_v53 }
  0x4a   :  { %192 = vmatprep.subr.bf16.mxu0 %v748_v15  ;;  %531 = vmatprep.subr.bf16.mxu1 %v770_v24  ;;  %v243_v59 = vstv %s242_s8 }
  0x4b   :  { %v236_v55 = vmul.u32 256, %v231_v52  ;;  %v237_v57 = vadd.s32 %v235_v54, %v233_v53  ;;  %v238_v60 = vadd.s32 %v235_v54, %v234_v56 }
  0x4d   :  { %193 = vmatpush1.bf16.msra.mxu0 %v750_v17  ;;  %532 = vmatpush1.bf16.msra.mxu1 %v772_v26  ;;  %v239_v58 = vadd.s32 %v236_v55, %v233_v53  ;;  %v240_v61 = vadd.s32 %v236_v55, %v234_v56  ;;  %v996_v62 = vxor.u32 %v243_v59, %v237_v57  ;;  %v908_v53 = vmov 0.0  }
  0x4e   :  { %194 = vmatprep.subr.bf16.mxu0 %v751_v19  ;;  %533 = vmatprep.subr.bf16.mxu1 %v773_v27  ;;  %v1000_v0 = vxor.u32 %v243_v59, %v238_v60 }
  0x4f   :  { %v998_v63 = vxor.u32 %v243_v59, %v239_v58  ;;  %v1002_v1 = vxor.u32 %v243_v59, %v240_v61  ;;  %v253_v2 = vshrl.u32 %v996_v62, 16 }
  0x50   :  { %v254_v4 = vshrl.u32 %v1000_v0, 16 }
  0x51   :  { %195 = vmatpush1.bf16.msra.mxu0 %v753_v21  ;;  %534 = vmatpush1.bf16.msra.mxu1 %v775_v29  ;;  %v255_v3 = vshrl.u32 %v998_v63, 16  ;;  %v256_v5 = vshrl.u32 %v1002_v1, 16  ;;  %v257_v6 = vxor.u32 %v253_v2, %v996_v62 }
  0x52   :  { %196 = vmatprep.subr.bf16.mxu0 %v754_v23  ;;  %535 = vmatprep.subr.bf16.mxu1 %v776_v30  ;;  %v258_v8 = vxor.u32 %v254_v4, %v1000_v0 }
  0x53   :  { %v259_v7 = vxor.u32 %v255_v3, %v998_v63  ;;  %v260_v9 = vxor.u32 %v256_v5, %v1002_v1  ;;  %v261_v10 = vmul.u32 2146121005, %v257_v6 }
  0x54   :  { %v262_v12 = vmul.u32 2146121005, %v258_v8 }
  0x55   :  { %197 = vmatpush1.bf16.msra.mxu0 %v756_v25  ;;  %536 = vmatpush1.bf16.msra.mxu1 %v778_v31  ;;  %v263_v11 = vmul.u32 2146121005, %v259_v7  ;;  %v264_v13 = vmul.u32 2146121005, %v260_v9  ;;  %v265_v14 = vshrl.u32 %v261_v10, 15 }
  0x56   :  { %537 = vmatprep.subr.bf16.mxu1 %v779_v32  ;;  %v266_v16 = vshrl.u32 %v262_v12, 15 }
  0x57   :  { %v267_v15 = vshrl.u32 %v263_v11, 15  ;;  %v268_v17 = vshrl.u32 %v264_v13, 15  ;;  %v269_v18 = vxor.u32 %v265_v14, %v261_v10 }
  0x58   :  { %215 = vmatmul.mubr.bf16.vlgmr.msra.gmra.mrb[0].mxu0 %v757_v28  ;;  %v270_v20 = vxor.u32 %v266_v16, %v262_v12 }
  0x59   :  { %538 = vmatpush1.bf16.msra.mxu1 %v781_v33  ;;  %v271_v19 = vxor.u32 %v267_v15, %v263_v11  ;;  %v272_v21 = vxor.u32 %v268_v17, %v264_v13  ;;  %v273_v22 = vmul.u32 2221713035, %v269_v18 }
  0x5a   :  { %539 = vmatprep.subr.bf16.mxu1 %v782_v34  ;;  %v274_v24 = vmul.u32 2221713035, %v270_v20  ;;  %v575_v20 = vxor.u32 2246822507, %v1000_v0 }
  0x5b   :  { %v275_v23 = vmul.u32 2221713035, %v271_v19  ;;  %v276_v25 = vmul.u32 2221713035, %v272_v21  ;;  %v277_v26 = vshrl.u32 %v273_v22, 16 }
  0x5c   :  { %v278_v28 = vshrl.u32 %v274_v24, 16  ;;  %v574_v19 = vxor.u32 2246822507, %v996_v62  ;;  %v576_v21 = vxor.u32 2246822507, %v998_v63 }
  0x5d   :  { %540 = vmatpush1.bf16.msra.mxu1 %v784_v35  ;;  %v279_v27 = vshrl.u32 %v275_v23, 16  ;;  %v280_v29 = vshrl.u32 %v276_v25, 16  ;;  %v281_v30 = vxor.u32 %v277_v26, %v273_v22  ;;  %v577_v22 = vxor.u32 2246822507, %v1002_v1 }
  0x5e   :  { %541 = vmatprep.subr.bf16.mxu1 %v785_v36  ;;  %v282_v32 = vxor.u32 %v278_v28, %v274_v24  ;;  %v579_v24 = vshrl.u32 %v575_v20, 16 }
  0x5f   :  { %v283_v31 = vxor.u32 %v279_v27, %v275_v23  ;;  %v284_v33 = vxor.u32 %v280_v29, %v276_v25  ;;  %v285_v34 = vshrl.u32 %v281_v30, 9  ;;  %v578_v23 = vshrl.u32 %v574_v19, 16 }
  0x60   :  { %v286_v36 = vshrl.u32 %v282_v32, 9  ;;  %v580_v25 = vshrl.u32 %v576_v21, 16  ;;  %v581_v26 = vshrl.u32 %v577_v22, 16  ;;  %v583_v28 = vxor.u32 %v579_v24, %v575_v20 }
  0x61   :  { %542 = vmatpush1.bf16.msra.mxu1 %v787_v37  ;;  %v287_v35 = vshrl.u32 %v283_v31, 9  ;;  %v288_v37 = vshrl.u32 %v284_v33, 9  ;;  %v582_v27 = vxor.u32 %v578_v23, %v574_v19 }
  0x62   :  { %543 = vmatprep.subr.bf16.mxu1 %v788_v38  ;;  %v289_v38 = vcvt.s32.f32 %v285_v34  ;;  %v584_v29 = vxor.u32 %v580_v25, %v576_v21  ;;  %v585_v30 = vxor.u32 %v581_v26, %v577_v22  ;;  %v587_v32 = vmul.u32 2146121005, %v583_v28 }
  0x63   :  { %v586_v31 = vmul.u32 2146121005, %v582_v27 }
  0x64   :  { %v588_v33 = vmul.u32 2146121005, %v584_v29  ;;  %v589_v34 = vmul.u32 2146121005, %v585_v30  ;;  %v591_v62 = vshrl.u32 %v587_v32, 15 }
  0x65   :  { %544 = vmatpush1.bf16.msra.mxu1 %v790_v39  ;;  %v291_v39 = vcvt.s32.f32 %v287_v35  ;;  %v590_v35 = vshrl.u32 %v586_v31, 15 }
  0x66   :  { %545 = vmatprep.subr.bf16.mxu1 %v791_v40  ;;  %v290_v40 = vcvt.s32.f32 %v286_v36  ;;  %v592_v36 = vshrl.u32 %v588_v33, 15  ;;  %v593_v0 = vshrl.u32 %v589_v34, 15  ;;  %v595_v63 = vxor.u32 %v591_v62, %v587_v32 }
  0x68   :  { %v597_v1 = vxor.u32 %v593_v0, %v589_v34 }
  0x69   :  { %546 = vmatpush1.bf16.msra.mxu1 %v793_v41  ;;  %v292_v41 = vcvt.s32.f32 %v288_v37  ;;  %v594_v37 = vxor.u32 %v590_v35, %v586_v31 }
  0x6a   :  { %547 = vmatprep.subr.bf16.mxu1 %v794_v42  ;;  %v88_v42 = vsub.s32 0, %v989_v51 }
  0x6d   :  { %548 = vmatpush1.bf16.msra.mxu1 %v796_v43  ;;  %v293_v43 = vmul.f32 1.1920929e-07, %v289_v38  ;;  %v596_v38 = vxor.u32 %v592_v36, %v588_v33 }
  0x6e   :  { %549 = vmatprep.subr.bf16.mxu1 %v797_v44  ;;  %v295_v44 = vmul.f32 1.1920929e-07, %v291_v39  ;;  %v598_v39 = vmul.u32 2221713035, %v594_v37 }
  0x6f   :  { %vm297_vm0 = vcmp.ge.f32.partialorder %v293_v43, 0.5  ;;  %v601_v43 = vmul.u32 2221713035, %v597_v1 }
  0x70   :  { %vm299_vm1 = vcmp.ge.f32.partialorder %v295_v44, 0.5  ;;  %v681_v54 = vsel %vm297_vm0, 1.0, %v908_v53  ;;  %v602_v44 = vshrl.u32 %v598_v39, 16 }
  0x71   :  { %550 = vmatpush1.bf16.msra.mxu1 %v799_v45  ;;  %v84_v45 = vld [vmem:[%s1055_s3] sm:$0x3]  ;;  %v683_v55 = vsel %vm299_vm1, 1.0, %v908_v53  ;;  %v309_v3 = vmul.f32 2.0, %v681_v54 }
  0x72   :  { %551 = vmatprep.subr.bf16.mxu1 %v800_v46  ;;  %v92_v46 = vsub.s32 1, %v989_v51  ;;  %v311_v5 = vmul.f32 2.0, %v683_v55 }
  0x74   :  { %v93_v50 = vrot.slane %v84_v45, %v92_v46 }
  0x75   :  { %552 = vmatpush1.bf16.msra.mxu1 %v802_v47  ;;  %v294_v47 = vmul.f32 1.1920929e-07, %v290_v40  ;;  %v599_v40 = vmul.u32 2221713035, %v595_v63 }
  0x76   :  { %553 = vmatprep.subr.bf16.mxu1 %v803_v48  ;;  %v296_v48 = vmul.f32 1.1920929e-07, %v292_v41  ;;  %v600_v41 = vmul.u32 2221713035, %v596_v38 }
  0x77   :  { %vm298_vm2 = vcmp.ge.f32.partialorder %v294_v47, 0.5 }
  0x78   :  { %vm300_vm3 = vcmp.ge.f32.partialorder %v296_v48, 0.5  ;;  %v682_v58 = vsel %vm298_vm2, 1.0, %v908_v53  ;;  %v604_v47 = vshrl.u32 %v600_v41, 16  ;;  %v605_v48 = vshrl.u32 %v601_v43, 16 }
  0x79   :  { %554 = vmatpush1.bf16.msra.mxu1 %v805_v49  ;;  %v89_v49 = vrot.slane %v84_v45, %v88_v42  ;;  %v684_v59 = vsel %vm300_vm3, 1.0, %v908_v53  ;;  %v310_v9 = vmul.f32 2.0, %v682_v58  ;;  %v603_v45 = vshrl.u32 %v599_v40, 16 }
  0x7a   :  { %v312_v10 = vmul.f32 2.0, %v684_v59  ;;  %v609_v54 = vxor.u32 %v605_v48, %v601_v43 }
  0x7c   :  { %v613_v58 = vshrl.u32 %v609_v54, 9 }
 0x12b   :  { %v216_v52 = vpop.f32.mrb[0].mxu0 }
 0x12c   :  { %v217_v56 = vadd.f32 %v216_v52, %v89_v49  ;;  %v218_v57 = vpop.f32.mrb[1].mxu0  ;;  %v608_v52 = vxor.u32 %v604_v47, %v600_v41 }
 0x12d   :  { %v219_v60 = vadd.f32 %v218_v57, %v93_v50  ;;  %v220_v61 = vpop.f32.mrb[2].mxu0 }
 0x12e   :  { %v225_v2 = vmax.f32 %v217_v56, 0.0  ;;  %v221_v4 = vadd.f32 %v220_v61, %v89_v49  ;;  %v222_v6 = vpop.f32.mrb[3].mxu0  ;;  %v606_v49 = vxor.u32 %v602_v44, %v598_v39  ;;  %v612_v57 = vshrl.u32 %v608_v52, 9 }
 0x12f   :  { %v226_v7 = vmax.f32 %v219_v60, 0.0  ;;  %v223_v8 = vadd.f32 %v222_v6, %v93_v50  ;;  %v607_v50 = vxor.u32 %v603_v45, %v599_v40  ;;  %v351_v6 = vld [vmem:[%s1057_s5] sm:$0x3]  ;;  %s909_s5 = smov [#allocation10]  }
 0x130   :  { %v227_v11 = vmax.f32 %v221_v4, 0.0  ;;  %v313_v13 = vmul.f32 %v309_v3, %v225_v2  ;;  %v610_v55 = vshrl.u32 %v606_v49, 9  ;;  %v616_v61 = vcvt.s32.f32 %v612_v57  ;;  %s651_s15 = sshll.u32 %s909_s5, 4  ;;  %s652_s15 = int_to_ptr.vmem [resolvable:$true] %s651_s15 }
 0x131   :  { %v228_v12 = vmax.f32 %v223_v8, 0.0  ;;  %v314_v15 = vmul.f32 %v310_v9, %v226_v7  ;;  %v611_v56 = vshrl.u32 %v607_v50, 9  ;;  %v617_v2 = vcvt.s32.f32 %v613_v58  ;;  %s872_s16 = scalar_lea.vmem %s652_s15, 512  ;;  %p877_p11 = scmp.lt.s32.totalorder %s652_s15, %s652_s15 }
 0x132   :  { %v315_v14 = vmul.f32 %v311_v5, %v227_v11  ;;  %v614_v59 = vcvt.s32.f32 %v610_v55  ;;  %v620_v5 = vmul.f32 1.1920929e-07, %v616_v61  ;;  %v356_v8 = vrot.slane %v351_v6, %v88_v42  ;;  %p873_p10 = scmp.ne.s32.totalorder %s652_s15, %s872_s16  ;;  %p878_p12 = scmp.lt.s32.totalorder %s872_s16, %s872_s16 }
 0x133   :  { %v316_v16 = vmul.f32 %v312_v10, %v228_v12  ;;  %v615_v60 = vcvt.s32.f32 %v611_v56  ;;  %v621_v7 = vmul.f32 1.1920929e-07, %v617_v2  ;;  %v360_v10 = vrot.slane %v351_v6, %v92_v46 }
 0x134   :  { %v317_v17 = vpack.c.bf16 %v315_v14, %v313_v13  ;;  %v618_v3 = vmul.f32 1.1920929e-07, %v614_v59  ;;  %vm624_vm6 = vcmp.ge.f32.partialorder %v620_v5, 0.5  ;;  %p879_p13 = por %p878_p12, %p877_p11 }
 0x135   :  { %v318_v18 = vpack.c.bf16 %v316_v16, %v314_v15  ;;  %v619_v4 = vmul.f32 1.1920929e-07, %v615_v60  ;;  %vm625_vm7 = vcmp.ge.f32.partialorder %v621_v7, 0.5  ;;  %v719_v13 = vsel %vm624_vm6, 1.0, %v908_v53 }
 0x136   :  { %vm622_vm4 = vcmp.ge.f32.partialorder %v618_v3, 0.5  ;;  %v636_v22 = vmul.f32 2.0, %v719_v13  ;;  %p880_p0 = pnand %p879_p13, %p873_p10 }
 0x137   :  { %555 = vmatprep.mubr.bf16.mxu1 %v318_v18  ;;  %vm623_vm5 = vcmp.ge.f32.partialorder %v619_v4, 0.5  ;;  %v717_v9 = vsel %vm622_vm4, 1.0, %v908_v53 }
 0x138   :  { %556 = vmatmul.mubr.bf16.vlgmr.msra.gmra.mrb[0].mxu1 %v317_v17  ;;  %v718_v11 = vsel %vm623_vm5, 1.0, %v908_v53  ;;  %v634_v15 = vmul.f32 2.0, %v717_v9  ;;  %v720_v17 = vsel %vm625_vm7, 1.0, %v908_v53 }
 0x139   :  { %v635_v19 = vmul.f32 2.0, %v718_v11  ;;  %v637_v24 = vmul.f32 2.0, %v720_v17 }
 0x20b   :  { %v557_v12 = vpop.f32.mrb[0].mxu1 }
 0x20c   :  { %v558_v14 = vadd.f32 %v557_v12, %v356_v8  ;;  %v559_v16 = vpop.f32.mrb[1].mxu1 }
 0x20d   :  { %v560_v18 = vadd.f32 %v559_v16, %v360_v10  ;;  %v561_v42 = vpop.f32.mrb[2].mxu1 }
 0x20e   :  { %v566_v20 = vmax.f32 %v558_v14, 0.0  ;;  %v562_v21 = vadd.f32 %v561_v42, %v356_v8  ;;  %v563_v23 = vpop.f32.mrb[3].mxu1 }
 0x20f   :  { %v567_v51 = vmax.f32 %v560_v18, 0.0  ;;  %v564_v46 = vadd.f32 %v563_v23, %v360_v10 }
 0x210   :  { %v638_v25 = vmul.f32 %v634_v15, %v566_v20  ;;  %v568_v26 = vmax.f32 %v562_v21, 0.0 }
 0x211   :  { %v639_v27 = vmul.f32 %v635_v19, %v567_v51  ;;  %v569_v28 = vmax.f32 %v564_v46, 0.0 }
 0x212   :  { %642 = vst [vmem:[#allocation10] sm:$0xff] %v638_v25  ;;  %v640_v29 = vmul.f32 %v636_v22, %v568_v26 }
 0x213   :  { %643 = vst [vmem:[#allocation10 + $0x8] sm:$0xff] %v639_v27  ;;  %v641_v53 = vmul.f32 %v637_v24, %v569_v28 }
 0x214   :  { %644 = vst [vmem:[#allocation10 + $0x10] sm:$0xff] %v640_v29 }
 0x215   :  { %645 = vst [vmem:[#allocation10 + $0x18] sm:$0xff] %v641_v53 }
 0x216   :  { %883 = shalt.err (!%p880_p0)
}
 0x217   :  { %s884_s19 = scalar_lea.hbm %s1058_s6, 512 }
 0x218   :  { %p885_p1 = scmp.ne.s32.totalorder %s1058_s6, %s884_s19  ;;  %p888_p2 = scmp.lt.u32.totalorder %s884_s19, %s1058_s6 }
 0x21a   :  { %p890_p3 = pnand %p888_p2, %p885_p1 }
 0x21c   :  { %893 = shalt.err (!%p890_p3)
}
 0x21d   :  { %s910_s23 = smov 256   ;;  %s911_s24 = smov 16  }
 0x21e   :  { %657 = dma.vmem_to_hbm [thread:$0]  %s652_s15, 512, %s1058_s6, [#allocation6], %s910_s23, %s910_s23, %s911_s24  }
 0x21f   :  { %898 = dma.done.wait [#allocation6], 512  }
 0x220   :  { %899 = vsyncadd [#allocation6], 4294966784 }
 0x221   :  { %661 = vsyncpa [#allocation5], 1 }
 0x222   :  { %662 = vsyncpa [#allocation8], 1 }
 0x223   :  { %663 = vsyncpa [#allocation6], 1 }

</bundles_post_ra>
